<compile_context>
chip_gen: v7x
topology: tpu7x:2x2x1
jax: 0.10.0
libtpu: 0.0.40
codegen_flags: <defaults>
</compile_context>

<pallas_src>
import math

import jax
import jax.numpy as jnp
import numpy as np
from jax import lax
from jax.experimental import pallas as pl
from jax.experimental.pallas import tpu as pltpu

BATCH_NORM_EPSILON = 1e-05

_VMEM_BUDGET = 24 * 1024 * 1024  # per-step working-set target, safe on all gens


# ---------------------------------------------------------------------------
# Pallas kernel: fused (im2col-matmul conv + BN) + ReLU + spatial mean
# ---------------------------------------------------------------------------
def conv_bn_relu_mean_kernel(p_ref, w_ref, avg_ref, o_ref):
    # p_ref:   (1, Kp, BT*HW)  bf16  K-major patches (+ constant-1 bias row)
    # w_ref:   (Coutp, Kp)     bf16  BN-scale-folded weights (+ BN-bias column)
    # avg_ref: (BTp, BT*HW)    bf16  block 1/HW averaging matrix (zero-pad rows)
    # o_ref:   (1, BTp, Coutp) f32   per-image spatially averaged features
    y = jnp.dot(w_ref[...], p_ref[0],
                preferred_element_type=jnp.float32)          # (Coutp, BT*HW) MXU
    y = jnp.maximum(y, 0.0).astype(jnp.bfloat16)             # ReLU (bias in matmul)
    # spatial mean per image via a second MXU contraction (no reshape/transpose)
    m = lax.dot_general(avg_ref[...], y,
                        dimension_numbers=(((1,), (1,)), ((), ())),
                        preferred_element_type=jnp.float32)  # (BTp, Coutp)
    o_ref[0] = m.astype(o_ref.dtype)                         # lane-dense store


# ---------------------------------------------------------------------------
# Batch-tile picker: VMEM-budget and pipeline driven (not "largest divisor")
# ---------------------------------------------------------------------------
def _pick_batch_tile(n, kp, hw, coutp, budget_bytes=_VMEM_BUDGET):
    def footprint(bt):
        kp_pad = ((kp + 15) // 16) * 16
        btp = ((bt + 7) // 8) * 8
        patches = 2 * kp_pad * bt * hw * 2          # bf16 input, double-buffered
        weights = 2 * coutp * max(kp_pad, 128) * 2  # bf16 weight tile
        avg = btp * bt * hw * 2                     # bf16 averaging matrix
        inter = coutp * bt * hw * 4                 # f32 activation intermediate
        out = 2 * btp * coutp * 4                   # f32 output, double-buffered
        return patches + weights + avg + inter + out

    divisors = [d for d in range(1, n + 1) if n % d == 0]
    # Prefer bt <= 64 within budget with nb even and >= 4 (feeds both v7x TCs
    # with pipelined steps); relax the nb constraint if N is tiny.
    for min_nb, need_even in ((4, True), (2, True), (2, False), (1, False)):
        cands = [d for d in divisors
                 if d <= 64 and footprint(d) <= budget_bytes
                 and (n // d) >= min_nb
                 and (not need_even or (n // d) % 2 == 0)]
        if cands:
            return max(cands)
    return 1


# ---------------------------------------------------------------------------
# Wrapper: layout glue + pallas_call
# ---------------------------------------------------------------------------
def resnet_mini_forward(x_nchw, w_conv, bn_scale, bn_bias, batch_tile=None):
    """x_nchw: [N, Cin, H, W] float32 -> [N, Cout] float32."""
    N, Cin, H, W = x_nchw.shape
    Cout = w_conv.shape[0]
    K = 3 * 3 * Cin
    Kp = K + 1                              # extra constant-1 row folds the BN bias
    HW = H * W
    coutp = ((Cout + 127) // 128) * 128     # pad Cout for unmasked lane stores

    bt = batch_tile if batch_tile is not None else _pick_batch_tile(N, Kp, HW, coutp)
    assert N % bt == 0
    nb = N // bt
    btp = ((bt + 7) // 8) * 8               # sublane-aligned output rows

    # --- glue (done once by XLA): NCHW -> NHWC -> 3x3 im2col -> [nb, Kp, bt*HW]
    x = jnp.transpose(x_nchw, (0, 2, 3, 1))                     # [N, H, W, Cin]
    xp = jnp.pad(x, ((0, 0), (1, 1), (1, 1), (0, 0)))
    cols = [xp[:, dh:dh + H, dw:dw + W, :] for dh in range(3) for dw in range(3)]
    patches = jnp.stack(cols, axis=3).reshape(N, HW, K)         # (kh, kw, cin) order
    patches = patches.reshape(nb, bt, HW, K)
    patches = jnp.transpose(patches, (0, 3, 1, 2)).reshape(nb, K, bt * HW)
    ones_row = jnp.ones((nb, 1, bt * HW), patches.dtype)        # bias row
    patches = jnp.concatenate([patches, ones_row], axis=1)      # [nb, Kp, bt*HW]
    patches = patches.astype(jnp.bfloat16)

    # conv weight (Cout, Cin, 3, 3) -> (Cout, K) in (kh, kw, cin) order,
    # fold the BN scale, append the BN bias column, pad channels to coutp.
    w_mat = jnp.transpose(w_conv, (0, 2, 3, 1)).reshape(Cout, K)
    w_mat = w_mat * bn_scale[:, None]
    w_mat = jnp.concatenate([w_mat, bn_bias[:, None].astype(w_mat.dtype)], axis=1)
    w_mat = jnp.pad(w_mat, ((0, coutp - Cout), (0, 0))).astype(jnp.bfloat16)

    # block-diagonal averaging matrix: row b holds 1/HW over image b's window.
    avg = jnp.kron(jnp.eye(bt, dtype=jnp.float32),
                   jnp.full((1, HW), 1.0 / HW, jnp.float32))    # (bt, bt*HW)
    avg = jnp.pad(avg, ((0, btp - bt), (0, 0))).astype(jnp.bfloat16)

    cost = pl.CostEstimate(
        flops=2 * N * HW * Kp * coutp + 2 * nb * btp * coutp * bt * HW,
        transcendentals=0,
        bytes_accessed=(patches.size * 2 + w_mat.size * 2 + avg.size * 2
                        + nb * btp * coutp * 4))

    out = pl.pallas_call(
        conv_bn_relu_mean_kernel,
        out_shape=jax.ShapeDtypeStruct((nb, btp, coutp), jnp.float32),
        grid=(nb,),
        in_specs=[
            # one contiguous lane-dense slab per step; bump to
            # pipeline_mode=pl.Buffered(3) only if xprof shows exposed DMA.
            pl.BlockSpec((1, Kp, bt * HW), lambda b: (b, 0, 0)),
            pl.BlockSpec((coutp, Kp), lambda b: (0, 0)),
            pl.BlockSpec((btp, bt * HW), lambda b: (0, 0)),
        ],
        out_specs=pl.BlockSpec((1, btp, coutp), lambda b: (b, 0, 0)),
        compiler_params=pltpu.CompilerParams(
            dimension_semantics=("parallel",),
            vmem_limit_bytes=48 * 1024 * 1024),
        cost_estimate=cost,
    )(patches, w_mat, avg)

    return out[:, :bt, :Cout].reshape(N, Cout)


# ---------------------------------------------------------------------------
# Deterministic parameter construction (matches __init__ shapes / init scheme)
# ---------------------------------------------------------------------------
def make_params(key, width_multiplier=1, in_channels=3):
    channels = 64 * width_multiplier
    fan_in = in_channels * 3 * 3
    stddev = math.sqrt(1.0 / max(1.0, fan_in)) / 0.8796256610342398
    w = jax.random.truncated_normal(
        key, -2.0, 2.0, (channels, in_channels, 3, 3), dtype=jnp.float32) * stddev
    # BatchNorm inference with fresh init: gamma=1, beta=0, mean=0, var=1
    gamma = jnp.ones((channels,), jnp.float32)
    beta = jnp.zeros((channels,), jnp.float32)
    running_mean = jnp.zeros((channels,), jnp.float32)
    running_var = jnp.ones((channels,), jnp.float32)
    bn_scale = gamma / jnp.sqrt(running_var + BATCH_NORM_EPSILON)
    bn_bias = beta - running_mean * bn_scale
    return w, bn_scale, bn_bias


# Plain-JAX reference for verification (same semantics, full f32)
def reference_forward(x_nchw, w_conv, bn_scale, bn_bias):
    y = lax.conv_general_dilated(
        x_nchw, w_conv, window_strides=(1, 1), padding=((1, 1), (1, 1)),
        dimension_numbers=("NCHW", "OIHW", "NCHW"))
    y = y * bn_scale[None, :, None, None] + bn_bias[None, :, None, None]
    y = jnp.maximum(y, 0.0)
    return jnp.mean(y, axis=(2, 3))


if __name__ == "__main__":
    key = jax.random.PRNGKey(0)
    kx, kw = jax.random.split(key)

    N, Cin, H, W = 2, 3, 16, 16
    x = jax.random.normal(kx, (N, Cin, H, W), dtype=jnp.float32)

    w_conv, bn_scale, bn_bias = make_params(kw, width_multiplier=1,
                                            in_channels=Cin)

    out = resnet_mini_forward(x, w_conv, bn_scale, bn_bias)
    out = jax.block_until_ready(out)

    ref = jax.block_until_ready(reference_forward(x, w_conv, bn_scale, bn_bias))
    # bf16 matmul inputs / bf16 activation feed to the averaging matmul with
    # f32 accumulation -> loosened tolerance
    np.testing.assert_allclose(np.asarray(out), np.asarray(ref),
                               rtol=2e-2, atol=5e-3)

    print("KERNEL_OK")
</pallas_src>

<mosaic_0001>
module attributes {stable_mosaic.version = 11 : i64} {
  func.func @conv_bn_relu_mean_kernel(%arg0: i32, %arg1: memref<1x28x256xbf16, #tpu.memory_space<vmem>>, %arg2: memref<128x28xbf16, #tpu.memory_space<vmem>>, %arg3: memref<8x256xbf16, #tpu.memory_space<vmem>>, %arg4: memref<1x8x128xf32, #tpu.memory_space<vmem>>) attributes {dimension_semantics = [#tpu.dimension_semantics<parallel>], iteration_bounds = array<i64: 2>, scalar_prefetch = 0 : i64, scratch_operands = 0 : i64, tpu.core_type = #tpu.core_type<tc>, window_params = [{transform_indices = @transform_0, window_bounds = array<i64: 1, 28, 256>}, {pipeline_mode = #tpu.pipeline_mode<synchronous>, transform_indices = @transform_1, window_bounds = array<i64: 128, 28>}, {pipeline_mode = #tpu.pipeline_mode<synchronous>, transform_indices = @transform_2, window_bounds = array<i64: 8, 256>}, {transform_indices = @transform_3, window_bounds = array<i64: 1, 8, 128>}]} {
    %c0 = arith.constant 0 : index
    %c0_0 = arith.constant 0 : index
    %0 = vector.load %arg2[%c0, %c0_0] : memref<128x28xbf16, #tpu.memory_space<vmem>>, vector<128x28xbf16>
    %c0_1 = arith.constant 0 : index
    %c0_2 = arith.constant 0 : index
    %c0_3 = arith.constant 0 : index
    %1 = vector.load %arg1[%c0_1, %c0_2, %c0_3] : memref<1x28x256xbf16, #tpu.memory_space<vmem>>, vector<1x28x256xbf16>
    %2 = vector.shape_cast %1 : vector<1x28x256xbf16> to vector<28x256xbf16>
    %cst = arith.constant dense<0.000000e+00> : vector<128x256xf32>
    %3 = tpu.matmul %0, %2, %cst {dimension_numbers = #tpu.dot_dimension_numbers<[1], [0], [0], [1], [0, 0, 1, 1], [], []>} : vector<128x28xbf16>, vector<28x256xbf16>, vector<128x256xf32> -> vector<128x256xf32>
    %cst_4 = arith.constant 0.000000e+00 : f32
    %4 = vector.broadcast %cst_4 : f32 to vector<128x256xf32>
    %5 = arith.maximumf %3, %4 : vector<128x256xf32>
    %6 = arith.truncf %5 : vector<128x256xf32> to vector<128x256xbf16>
    %c0_5 = arith.constant 0 : index
    %c0_6 = arith.constant 0 : index
    %7 = vector.load %arg3[%c0_5, %c0_6] : memref<8x256xbf16, #tpu.memory_space<vmem>>, vector<8x256xbf16>
    %cst_7 = arith.constant dense<0.000000e+00> : vector<8x128xf32>
    %8 = tpu.matmul %7, %6, %cst_7 {dimension_numbers = #tpu.dot_dimension_numbers<[1], [1], [0], [0], [0, 0, 1, 0], [], []>} : vector<8x256xbf16>, vector<128x256xbf16>, vector<8x128xf32> -> vector<8x128xf32>
    %c0_8 = arith.constant 0 : index
    %c0_9 = arith.constant 0 : index
    %c0_10 = arith.constant 0 : index
    %9 = vector.load %arg4[%c0_8, %c0_9, %c0_10] : memref<1x8x128xf32, #tpu.memory_space<vmem>>, vector<1x8x128xf32>
    %10 = vector.shape_cast %9 : vector<1x8x128xf32> to vector<8x128xf32>
    %11 = vector.shape_cast %8 : vector<8x128xf32> to vector<1x8x128xf32>
    tpu.vector_store %arg4[%c0_8, %c0_9, %c0_10], %11 {strides = array<i32>} : memref<1x8x128xf32, #tpu.memory_space<vmem>>, vector<1x8x128xf32>,
    return
  }
  func.func @transform_0(%arg0: i32) -> (i32, i32, i32) {
    %c0_i32 = arith.constant 0 : i32
    %c0_i32_0 = arith.constant 0 : i32
    %c0_i32_1 = arith.constant 0 : i32
    return %arg0, %c0_i32, %c0_i32_0 : i32, i32, i32
  }
  func.func @transform_1(%arg0: i32) -> (i32, i32) {
    %c0_i32 = arith.constant 0 : i32
    %c0_i32_0 = arith.constant 0 : i32
    %c0_i32_1 = arith.constant 0 : i32
    return %c0_i32, %c0_i32_0 : i32, i32
  }
  func.func @transform_2(%arg0: i32) -> (i32, i32) {
    %c0_i32 = arith.constant 0 : i32
    %c0_i32_0 = arith.constant 0 : i32
    %c0_i32_1 = arith.constant 0 : i32
    return %c0_i32, %c0_i32_0 : i32, i32
  }
  func.func @transform_3(%arg0: i32) -> (i32, i32, i32) {
    %c0_i32 = arith.constant 0 : i32
    %c0_i32_0 = arith.constant 0 : i32
    %c0_i32_1 = arith.constant 0 : i32
    return %arg0, %c0_i32, %c0_i32_0 : i32, i32, i32
  }
}

</mosaic_0001>

<bundles_post_ra>
// kernel: tpu_custom_call.1
= control target key start
LH: loop header
LB: loop body
LE: loop exit
PB: predicated region body
PF: predicated region fallthrough
CT: control target
= control target key end

     0   :  { %8 = vsyncpa [#allocation3], 0  ;;  %s881_s0 = inlined_call_operand.vmem [shape: bf16[2,28,256], index: 0, kind: input, shape index: {}]   ;;  %s882_s1 = inlined_call_operand.vmem [shape: bf16[128,28], index: 1, kind: input, shape index: {}]   ;;  %s883_s2 = inlined_call_operand.vmem [shape: bf16[8,256], index: 2, kind: input, shape index: {}]   ;;  %s884_s3 = inlined_call_operand.hbm [shape: f32[2,8,128], index: 3, kind: output, shape index: {}]  }
   0x1   :  { %10 = vsyncpa [#allocation3 + $0x1], 0  ;;  %s740_s12 = smov 0   ;;  %s742_s13 = smov 0  }
   0x2   :  { %s744_s14 = smov 0   ;;  %s746_s15 = smov 0  }
   0x3 LB: > { %s761_s16 = sadd.s32 4294967295, %s716_s15   ;;  %s563_s17 = sadd.s32 4294967294, %s716_s15   ;;  %s716_s15 = sphi %s746_s15, %s890_s15   ;;  %s712_s14 = sphi %s744_s14, %s889_s14   ;;  %s708_s13 = sphi %s742_s13, %s888_s13   ;;  %s704_s12 = sphi %s740_s12, %s887_s12  }
   0x4   : > { %s765_s18 = sadd.s32 1, %s716_s15   ;;  %s91_s19 = sadd.s32 1, %s712_s14 }
   0x5   : > { %s88_s20 = ssub.s32 %s716_s15, %s765_s18  ;;  %p101_p0 = scmp.ne.s32.totalorder %s712_s14, %s708_s13 }
   0x6   : > { %p89_p1 = scmp.eq.s32.totalorder %s88_s20, 0  ;;  %p102_p2 = scmp.eq.s32.totalorder %s761_s16, 1 }
   0x7   : > { %p107_p3 = scmp.ne.s32.totalorder %s708_s13, %s704_s12  ;;  %p108_p4 = scmp.eq.s32.totalorder %s563_s17, 1 }
   0x8   : > { %s776_s21 = scalar_select %p89_p1, %s712_s14, %s91_s19  }
   0x9   : > { %p778_p5 = por %p102_p2, %p101_p0  ;;  %p782_p6 = por %p108_p4, %p107_p3 }
   0xa   : > { %p566_p7 = scmp.ge.s32.totalorder %s716_s15, 1  ;;  %p140_p8 = scmp.lt.s32.totalorder %s716_s15, 3 }
   0xc   : > { %p141_p9 = pnand %p566_p7, %p140_p8 }
   0xd   : > { %p164_p10 = scmp.lt.s32.totalorder (!%p141_p9), %s761_s16, 1  ;;  %v718_v0 = vmov (!%p141_p9), 0   ;;  %vm273_vm0 = vcmask (!%p141_p9), 1045504   ;;  %v644_v6 = vld [vmem:[%s882_s1] sm:$0xff] (!%p141_p9)   ;;  %vm248_vm1 = vcmask (!%p141_p9), 228352   ;;  %v645_v7 = vld [vmem:[%s882_s1 + $0x8] sm:$0xff] (!%p141_p9)  }
   0xe   : > { %144 = sbr.rel (%p141_p9) target bundleno = 544 (0x220), region = 32  ;;  %312 = vmatprep.mubr.bf16.mxu0 (!%p141_p9), %v718_v0  ;;  %v646_v8 = vld [vmem:[%s882_s1 + $0x10] sm:$0xff] (!%p141_p9)   ;;  %v647_v9 = vld [vmem:[%s882_s1 + $0x18] sm:$0xff] (!%p141_p9)   ;;  %v648_v10 = vld [vmem:[%s882_s1 + $0x20] sm:$0xff] (!%p141_p9)   ;;  %s161_s29 = sand.u32 (!%p141_p9), 1, %s708_s13  }
   0xf   : > { %v649_v11 = vld [vmem:[%s882_s1 + $0x28] sm:$0xff] (!%p141_p9)   ;;  %v650_v12 = vld [vmem:[%s882_s1 + $0x30] sm:$0xff] (!%p141_p9)   ;;  %v651_v13 = vld [vmem:[%s882_s1 + $0x38] sm:$0xff] (!%p141_p9)   ;;  %s567_s30 = sshll.u32 (!%p141_p9), %s161_s29, 3  ;;  %s594_s6 = sshll.u32 (!%p141_p9), %s761_s16, 7 }
  0x10   : > { %v828_v14 = vld [vmem:[%s883_s2] sm:$0xff] (!%p141_p9)  ;;  %s163_s4 = scalar_lea.vmem (!%p141_p9), [#allocation2], %s567_s30  ;;  %s841_s9 = scalar_lea.hbm (!%p141_p9), %s884_s3, %s594_s6 }
  0x11   : > { %v592_v15 = vcombine.high (!%p141_p9), %v828_v14, %v828_v14  ;;  %s504_s5 = sshll.u32 (!%p141_p9), %s163_s4, 4  ;;  %s491_s10 = scalar_lea.sflag (!%p141_p9), [#allocation3], %s161_s29  ;;  %s836_s5 = int_to_ptr.vmem [resolvable:$true] %s504_s5 }
  0x12   : > { %s654_s11 = scalar_lea.vmem (!%p141_p9), %s836_s5, 128 }
  0x13   : > { %481 = vmatprep.mubr.bf16.mxu1 (!%p141_p9), %v592_v15  ;;  %p655_p11 = scmp.ne.s32.totalorder (!%p141_p9), %s836_s5, %s654_s11 }
  0x15   : > { %s165_s24 = scalar_select %p164_p10, %s761_s16, 1 }
  0x16   : > { %p656_p12 = pnand %p655_p11, %p778_p5  ;;  %s719_s16 = smov [#allocation2]  }
  0x17   : > { %s597_s25 = sshll.u32 %s165_s24, 5  ;;  %s658_s17 = sshll.u32 %s719_s16, 4  ;;  %s659_s17 = int_to_ptr.vmem [resolvable:$false] %s658_s17 }
  0x18   : > { %s168_s28 = scalar_lea.vmem %s881_s0, %s597_s25  ;;  %p657_p13 = pneg %p656_p12 }
  0x19   : > { %v638_v1 = vld [vmem:[%s168_s28 + $0x4] ss:$8 sps:$4 sm:$0xff]   ;;  %v640_v2 = vld [vmem:[%s168_s28] ss:$8 sps:$4 sm:$0xff]   ;;  %s660_s19 = scalar_lea.vmem %s659_s17, 256  ;;  %p661_p0 = scmp.lt.s32.totalorder %s836_s5, %s659_s17 }
  0x1a   : > { %280 = vmatprep.subr.bf16.mxu0 %v638_v1  ;;  %v641_v3 = vld [vmem:[%s168_s28 + $0x14] ss:$8 sps:$4 sm:$0x3f]   ;;  %v643_v4 = vld [vmem:[%s168_s28 + $0x10] ss:$8 sps:$4 sm:$0x3f]   ;;  %p662_p1 = scmp.lt.s32.totalorder %s660_s19, %s654_s11 }
  0x1b   : > { %281 = vmatpush1.bf16.msra.mxu0 %v640_v2  ;;  %v275_v5 = vsel %vm273_vm0, %v643_v4, 0 }
  0x1c   : > { %582 = vmatprep.subr.msk.bf16.mxu0 %vm273_vm0, %v641_v3  ;;  %p663_p2 = por %p662_p1, %p661_p0 }
  0x1e   : > { %p664_p3 = pnand %p663_p2, %p657_p13 }
  0x1f   : > { %283 = vmatpush1.bf16.msra.mxu0 %v275_v5 }
  0x22   : > { %583 = vmatmul.mubr.msk.bf16.vlgmr.msra.gmra.mrb[0].mxu0 %vm248_vm1, %v644_v6 }
  0x23   : > { %322 = vmatprep.mubr.bf16.mxu0 %v718_v0 }
  0x2a   : > { %584 = vmatmul.mubr.msk.bf16.gmra.mrb[4].mxu0 %vm248_vm1, %v645_v7 }
  0x2b   : > { %332 = vmatprep.mubr.bf16.mxu0 %v718_v0 }
  0x32   : > { %585 = vmatmul.mubr.msk.bf16.gmra.mrb[8].mxu0 %vm248_vm1, %v646_v8 }
  0x33   : > { %342 = vmatprep.mubr.bf16.mxu0 %v718_v0 }
  0x3a   : > { %586 = vmatmul.mubr.msk.bf16.gmra.mrb[12].mxu0 %vm248_vm1, %v647_v9 }
  0x3b   : > { %352 = vmatprep.mubr.bf16.mxu0 %v718_v0 }
  0x42   : > { %587 = vmatmul.mubr.msk.bf16.gmra.mrb[16].mxu0 %vm248_vm1, %v648_v10 }
  0x43   : > { %362 = vmatprep.mubr.bf16.mxu0 %v718_v0 }
  0x4a   : > { %588 = vmatmul.mubr.msk.bf16.gmra.mrb[20].mxu0 %vm248_vm1, %v649_v11 }
  0x4b   : > { %372 = vmatprep.mubr.bf16.mxu0 %v718_v0 }
  0x52   : > { %589 = vmatmul.mubr.msk.bf16.gmra.mrb[24].mxu0 %vm248_vm1, %v650_v12 }
  0x53   : > { %382 = vmatprep.mubr.bf16.mxu0 %v718_v0 }
  0x5a   : > { %590 = vmatmul.mubr.msk.bf16.gmra.mrb[28].mxu0 %vm248_vm1, %v651_v13 }
  0xf5   : > { %v314_v16 = vpop.f32.mrb[0].mxu0 }
  0xf6   : > { %v316_v17 = vpop.f32.mrb[1].mxu0  ;;  %v393_v19 = vmax.f32 %v314_v16, 0.0 }
  0xf7   : > { %v318_v18 = vpop.f32.mrb[2].mxu0  ;;  %v394_v22 = vmax.f32 %v316_v17, 0.0 }
  0xf8   : > { %v395_v20 = vmax.f32 %v318_v18, 0.0  ;;  %v320_v21 = vpop.f32.mrb[3].mxu0 }
  0xf9   : > { %v396_v23 = vmax.f32 %v320_v21, 0.0 }
  0xfa   : > { %v425_v24 = vpack.c.bf16 %v395_v20, %v393_v19 }
  0xfb   : > { %v426_v25 = vpack.c.bf16 %v396_v23, %v394_v22 }
  0xfd   : > { %v324_v26 = vpop.f32.mrb[4].mxu0  ;;  %449 = vmatprep.subr.bf16.mxu1 %v426_v25 }
  0xfe   : > { %v326_v27 = vpop.f32.mrb[5].mxu0  ;;  %450 = vmatpush1.bf16.xpose.msra.mxu1 %v425_v24  ;;  %v397_v29 = vmax.f32 %v324_v26, 0.0 }
  0xff   : > { %v328_v28 = vpop.f32.mrb[6].mxu0  ;;  %v398_v32 = vmax.f32 %v326_v27, 0.0 }
 0x100   : > { %v399_v30 = vmax.f32 %v328_v28, 0.0  ;;  %v330_v31 = vpop.f32.mrb[7].mxu0 }
 0x101   : > { %v400_v33 = vmax.f32 %v330_v31, 0.0 }
 0x102   : > { %v427_v34 = vpack.c.bf16 %v399_v30, %v397_v29 }
 0x103   : > { %v428_v35 = vpack.c.bf16 %v400_v33, %v398_v32  ;;  %v591_v33 = vcombine.low %v828_v14, %v828_v14 }
 0x105   : > { %v334_v36 = vpop.f32.mrb[8].mxu0  ;;  %451 = vmatprep.subr.bf16.mxu1 %v428_v35 }
 0x106   : > { %v336_v37 = vpop.f32.mrb[9].mxu0  ;;  %452 = vmatpush1.bf16.xpose.msra.mxu1 %v427_v34  ;;  %v401_v39 = vmax.f32 %v334_v36, 0.0 }
 0x107   : > { %v338_v38 = vpop.f32.mrb[10].mxu0  ;;  %v402_v42 = vmax.f32 %v336_v37, 0.0 }
 0x108   : > { %v403_v40 = vmax.f32 %v338_v38, 0.0  ;;  %v340_v41 = vpop.f32.mrb[11].mxu0 }
 0x109   : > { %v404_v43 = vmax.f32 %v340_v41, 0.0 }
 0x10a   : > { %v429_v44 = vpack.c.bf16 %v403_v40, %v401_v39 }
 0x10b   : > { %v430_v45 = vpack.c.bf16 %v404_v43, %v402_v42 }
 0x10d   : > { %v344_v46 = vpop.f32.mrb[12].mxu0  ;;  %453 = vmatprep.subr.bf16.mxu1 %v430_v45 }
 0x10e   : > { %v346_v47 = vpop.f32.mrb[13].mxu0  ;;  %454 = vmatpush1.bf16.xpose.msra.mxu1 %v429_v44  ;;  %v405_v49 = vmax.f32 %v344_v46, 0.0 }
 0x10f   : > { %v348_v48 = vpop.f32.mrb[14].mxu0  ;;  %v406_v52 = vmax.f32 %v346_v47, 0.0 }
 0x110   : > { %v407_v50 = vmax.f32 %v348_v48, 0.0  ;;  %v350_v51 = vpop.f32.mrb[15].mxu0 }
 0x111   : > { %v408_v53 = vmax.f32 %v350_v51, 0.0 }
 0x112   : > { %v431_v54 = vpack.c.bf16 %v407_v50, %v405_v49 }
 0x113   : > { %v432_v55 = vpack.c.bf16 %v408_v53, %v406_v52 }
 0x115   : > { %v354_v56 = vpop.f32.mrb[16].mxu0  ;;  %455 = vmatprep.subr.bf16.mxu1 %v432_v55 }
 0x116   : > { %v356_v57 = vpop.f32.mrb[17].mxu0  ;;  %456 = vmatpush1.bf16.xpose.msra.mxu1 %v431_v54  ;;  %v409_v59 = vmax.f32 %v354_v56, 0.0 }
 0x117   : > { %v358_v58 = vpop.f32.mrb[18].mxu0  ;;  %v410_v62 = vmax.f32 %v356_v57, 0.0 }
 0x118   : > { %v411_v60 = vmax.f32 %v358_v58, 0.0  ;;  %v360_v61 = vpop.f32.mrb[19].mxu0 }
 0x119   : > { %v412_v63 = vmax.f32 %v360_v61, 0.0 }
 0x11a   : > { %v433_v0 = vpack.c.bf16 %v411_v60, %v409_v59 }
 0x11b   : > { %v434_v1 = vpack.c.bf16 %v412_v63, %v410_v62 }
 0x11d   : > { %v364_v2 = vpop.f32.mrb[20].mxu0  ;;  %457 = vmatprep.subr.bf16.mxu1 %v434_v1 }
 0x11e   : > { %v366_v3 = vpop.f32.mrb[21].mxu0  ;;  %458 = vmatpush1.bf16.xpose.msra.mxu1 %v433_v0  ;;  %v413_v5 = vmax.f32 %v364_v2, 0.0 }
 0x11f   : > { %v368_v4 = vpop.f32.mrb[22].mxu0  ;;  %v414_v8 = vmax.f32 %v366_v3, 0.0 }
 0x120   : > { %v415_v6 = vmax.f32 %v368_v4, 0.0  ;;  %v370_v7 = vpop.f32.mrb[23].mxu0 }
 0x121   : > { %v416_v9 = vmax.f32 %v370_v7, 0.0 }
 0x122   : > { %v435_v10 = vpack.c.bf16 %v415_v6, %v413_v5 }
 0x123   : > { %v436_v11 = vpack.c.bf16 %v416_v9, %v414_v8 }
 0x125   : > { %v374_v12 = vpop.f32.mrb[24].mxu0  ;;  %459 = vmatprep.subr.bf16.mxu1 %v436_v11 }
 0x126   : > { %v376_v13 = vpop.f32.mrb[25].mxu0  ;;  %460 = vmatpush1.bf16.xpose.msra.mxu1 %v435_v10  ;;  %v417_v16 = vmax.f32 %v374_v12, 0.0 }
 0x127   : > { %v378_v15 = vpop.f32.mrb[26].mxu0  ;;  %v418_v19 = vmax.f32 %v376_v13, 0.0 }
 0x128   : > { %v419_v17 = vmax.f32 %v378_v15, 0.0  ;;  %v380_v18 = vpop.f32.mrb[27].mxu0 }
 0x129   : > { %v420_v20 = vmax.f32 %v380_v18, 0.0 }
 0x12a   : > { %v437_v21 = vpack.c.bf16 %v419_v17, %v417_v16 }
 0x12b   : > { %v438_v22 = vpack.c.bf16 %v420_v20, %v418_v19 }
 0x12d   : > { %v384_v23 = vpop.f32.mrb[28].mxu0  ;;  %461 = vmatprep.subr.bf16.mxu1 %v438_v22 }
 0x12e   : > { %v386_v24 = vpop.f32.mrb[29].mxu0  ;;  %462 = vmatpush1.bf16.xpose.msra.mxu1 %v437_v21  ;;  %v421_v26 = vmax.f32 %v384_v23, 0.0 }
 0x12f   : > { %v388_v25 = vpop.f32.mrb[30].mxu0  ;;  %v422_v29 = vmax.f32 %v386_v24, 0.0 }
 0x130   : > { %v423_v27 = vmax.f32 %v388_v25, 0.0  ;;  %v390_v28 = vpop.f32.mrb[31].mxu0 }
 0x131   : > { %v424_v30 = vmax.f32 %v390_v28, 0.0 }
 0x132   : > { %v439_v31 = vpack.c.bf16 %v423_v27, %v421_v26 }
 0x133   : > { %v440_v32 = vpack.c.bf16 %v424_v30, %v422_v29 }
 0x135   : > { %463 = vmatprep.subr.bf16.mxu1 %v440_v32 }
 0x136   : > { %464 = vmatpush1.bf16.xpose.msra.mxu1 %v439_v31 }
 0x13d   : > { %482 = vmatmul.mubr.bf16.vlgmr.msra.gmra.mrb[0].mxu1 %v591_v33 }
 0x210   : > { %v483_v34 = vpop.f32.mrb[0].mxu1 }
 0x211   : > { %489 = vst [vmem:[%s163_s4] sm:$0xff] %v483_v34  ;;  %v485_v14 = vpop.f32.mrb[1].mxu1 }
 0x212   : > { %v486_v35 = vpop.f32.mrb[2].mxu1 }
 0x213   : > { %667 = shalt.err (!%p664_p3)
}
 0x214   : > { %s668_s20 = scalar_lea.hbm %s841_s9, 128  ;;  %s672_s26 = scalar_lea.hbm %s884_s3, 256 }
 0x215   : > { %p669_p4 = scmp.ne.s32.totalorder %s841_s9, %s668_s20  ;;  %p673_p9 = scmp.lt.u32.totalorder %s841_s9, %s884_s3 }
 0x216   : > { %p674_p10 = scmp.lt.u32.totalorder %s672_s26, %s668_s20  ;;  %p676_p12 = scmp.lt.u32.totalorder %s668_s20, %s841_s9 }
 0x217   : > { %p670_p7 = pnand %p669_p4, %p778_p5 }
 0x218   : > { %p675_p11 = por %p674_p10, %p673_p9 }
 0x219   : > { %p671_p8 = pneg %p670_p7 }
 0x21a   : > { %p677_p13 = por %p676_p12, %p675_p11 }
 0x21c   : > { %p678_p0 = pnand %p677_p13, %p671_p8 }
 0x21e   : > { %681 = shalt.err (!%p678_p0)
}
 0x21f   : > { %598 = dma.vmem_to_hbm [thread:$0]  (%p778_p5), %s836_s5, 128, %s841_s9, %s491_s10   ;;  %v487_v36 = vpop.f32.mrb[3].mxu1 }
 0x220 PF: > { %p604_p1 = scmp.ge.s32.totalorder %s716_s15, 2  ;;  %s516_s29 = sand.u32 1, %s704_s12  }
 0x221   : > { %s517_s30 = scalar_lea.sflag [#allocation3], %s516_s29 }
 0x222   : > { %p601_p2 = pnand %p604_p1, %p782_p6 }
 0x224   : > { %699 = dma.done.wait (!%p601_p2), %s517_s30, 128  }
 0x225   : > { %701 = vsyncadd (!%p601_p2), %s517_s30, 4294967168  ;;  %p13_p3 = scmp.ge.s32.totalorder %s765_s18, 4   ;;  %s887_s12 = smov %s708_s13 }
 0x226   : > { %s888_s13 = smov %s712_s14  ;;  %s889_s14 = smov %s776_s21 }
 0x227   : > { %s890_s15 = smov %s765_s18  ;;  %15 = sbr.rel (!%p13_p3) target bundleno = 3 (0x3), region = 67 }
 0x22e   :  { %522 = vsyncpa [#allocation3], 1 }
 0x22f   :  { %524 = vsyncpa [#allocation3 + $0x1], 1 }

</bundles_post_ra>
